<compile_context>
chip_gen: v5e
topology: v5e:2x2
jax: 0.10.0
libtpu: 0.0.40
codegen_flags: <defaults>
</compile_context>

<pallas_src>
import functools

import jax
import jax.numpy as jnp
import numpy as np
from jax.experimental import pallas as pl
from jax.experimental.pallas import tpu as pltpu

# Hyper-parameters from StereoL1Loss.__init__ (defaults), baked in as constants.
REL_WEIGHT = 1.0
REFERENCE_DECAY = 1.0
GAZE_WEIGHT = 1.0          # GazeLoss(gaze_weight=1.0)
_EPS_CLIP = 1e-7
_EPS_NORM = 1e-6
_RAD2DEG = 180.0 / np.pi

_LANES = 128
_MAX_TILE_LANES = 16 * 1024    # per-step input block = 8 * 16384 * 4B = 512 KiB


def _round_up(x, m):
    return ((x + m - 1) // m) * m


def _pitchyaw_to_vec(py):
    """py: (2, T) rows = (pitch, yaw) -> three (1, T) vector components."""
    pitch = py[0:1, :]
    yaw = py[1:2, :]
    cp = jnp.cos(pitch)                       # hoisted: used for both x and z
    x = cp * jnp.sin(yaw)
    y = jnp.sin(pitch)
    z = cp * jnp.cos(yaw)
    return x, y, z


def _angular_error_deg(pred, gt):
    """pred, gt: (2, T) -> per-sample angular error in degrees, shape (1, T)."""
    px, py_, pz = _pitchyaw_to_vec(pred)
    gx, gy, gz = _pitchyaw_to_vec(gt)
    dot = px * gx + py_ * gy + pz * gz
    pp = px * px + py_ * py_ + pz * pz
    gg = gx * gx + gy * gy + gz * gz
    # Vectors are unit-norm by construction; a single fused rsqrt replaces the reference's
    # sqrt/sqrt/divide (one EUP op instead of three) with fp parity well within tolerance.
    sim = dot * jax.lax.rsqrt(jnp.maximum(pp * gg, _EPS_NORM * _EPS_NORM))
    sim = jnp.clip(sim, -1.0 + _EPS_CLIP, 1.0 - _EPS_CLIP)
    # arccos(sim) expressed via atan2 (identical for sim in [-1, 1]).
    ang = jnp.arctan2(jnp.sqrt(jnp.maximum(1.0 - sim * sim, 0.0)), sim)
    return ang * (_RAD2DEG * GAZE_WEIGHT)


def stereo_l1_kernel(x_ref, out_ref, acc_ref, *, b_true):
    """x_ref: (8, TB) packed tile; out_ref: (1, 1); acc_ref: (1, TB) VMEM scratch.

    Row layout of x_ref:
      0:2 -> pred_gaze_0 (pitch, yaw)    2:4 -> gt_gaze_0
      4:6 -> pred_gaze_1 (pitch, yaw)    6:8 -> gt_gaze_1
    """
    i = pl.program_id(0)
    tb = x_ref.shape[1]

    @pl.when(i == 0)
    def _init():
        acc_ref[...] = jnp.zeros_like(acc_ref)

    x = x_ref[...]
    err0 = _angular_error_deg(x[0:2, :], x[2:4, :])   # (1, TB)
    err1 = _angular_error_deg(x[4:6, :], x[6:8, :])   # (1, TB)

    # Mask padded lanes (global lane index >= true batch size); one masked multiply total.
    lane = jax.lax.broadcasted_iota(jnp.int32, (1, tb), 1) + i * tb
    valid = (lane < b_true).astype(jnp.float32)

    acc_ref[...] += (err0 + REFERENCE_DECAY * err1) * valid

    @pl.when(i == pl.num_programs(0) - 1)
    def _finalize():
        total = jnp.sum(acc_ref[...], axis=1, keepdims=True)               # (1, 1)
        out_ref[...] = total * (REL_WEIGHT / b_true)


def stereo_l1_loss(pred_gaze_0, pred_gaze_1, gt_gaze_0, gt_gaze_1):
    """Inputs in PyTorch convention: (B, 2) pitch/yaw. Returns scalar float32 loss."""
    b = pred_gaze_0.shape[0]

    # Single packed slab: (4, B, 2) -> (4, 2, B) -> (8, B), padded on the lane axis.
    all4 = jnp.stack([pred_gaze_0, gt_gaze_0, pred_gaze_1, gt_gaze_1],
                     axis=0).astype(jnp.float32)                    # (4, B, 2)
    packed = jnp.transpose(all4, (0, 2, 1)).reshape(8, b)            # (8, B)

    tb = min(_round_up(b, _LANES), _MAX_TILE_LANES)
    b_pad = _round_up(b, tb)
    grid = b_pad // tb
    if b_pad != b:
        packed = jnp.pad(packed, ((0, 0), (0, b_pad - b)))

    out = pl.pallas_call(
        functools.partial(stereo_l1_kernel, b_true=b),
        out_shape=jax.ShapeDtypeStruct((1, 1), jnp.float32),
        grid_spec=pltpu.PrefetchScalarGridSpec(
            num_scalar_prefetch=0,
            grid=(grid,),
            in_specs=[pl.BlockSpec((8, tb), lambda i: (0, i))],
            out_specs=pl.BlockSpec((1, 1), lambda i: (0, 0)),
            scratch_shapes=[pltpu.VMEM((1, tb), jnp.float32)],
        ),
        compiler_params=pltpu.CompilerParams(
            dimension_semantics=("arbitrary",)),   # reduction axis with persistent acc
    )(packed)
    return out[0, 0]


def _reference(pred_gaze_0, pred_gaze_1, gt_gaze_0, gt_gaze_1):
    """Plain-JAX reference mirroring the PyTorch forward."""
    def to_vec(py):
        pitch, yaw = py[:, 0], py[:, 1]
        return jnp.stack([jnp.cos(pitch) * jnp.sin(yaw),
                          jnp.sin(pitch),
                          jnp.cos(pitch) * jnp.cos(yaw)], axis=1)

    def ang_err(pred, gt):
        a, bb = to_vec(pred), to_vec(gt)
        sim = jnp.sum(a * bb, axis=1) / jnp.maximum(
            jnp.linalg.norm(a, axis=1) * jnp.linalg.norm(bb, axis=1), _EPS_NORM)
        sim = jnp.clip(sim, -1.0 + _EPS_CLIP, 1.0 - _EPS_CLIP)
        return jnp.arccos(sim) * _RAD2DEG * GAZE_WEIGHT

    loss = jnp.mean(ang_err(pred_gaze_0, gt_gaze_0))
    loss_aux = jnp.mean(ang_err(pred_gaze_1, gt_gaze_1))
    return (loss + loss_aux * REFERENCE_DECAY) * REL_WEIGHT


if __name__ == "__main__":
    B = 8
    key = jax.random.PRNGKey(0)
    k0, k1, k2, k3 = jax.random.split(key, 4)
    # Small pitch/yaw angles (radians), PyTorch layout (B, 2).
    pred_gaze_0 = 0.3 * jax.random.normal(k0, (B, 2), dtype=jnp.float32)
    pred_gaze_1 = 0.3 * jax.random.normal(k1, (B, 2), dtype=jnp.float32)
    gt_gaze_0 = 0.3 * jax.random.normal(k2, (B, 2), dtype=jnp.float32)
    gt_gaze_1 = 0.3 * jax.random.normal(k3, (B, 2), dtype=jnp.float32)

    loss = stereo_l1_loss(pred_gaze_0, pred_gaze_1, gt_gaze_0, gt_gaze_1)
    loss = jax.block_until_ready(loss)

    ref = _reference(pred_gaze_0, pred_gaze_1, gt_gaze_0, gt_gaze_1)
    np.testing.assert_allclose(np.asarray(loss), np.asarray(ref), rtol=1e-4, atol=1e-4)

    print("KERNEL_OK")
</pallas_src>

<mosaic_0001>
module attributes {stable_mosaic.version = 11 : i64} {
  func.func @stereo_l1_kernel(%arg0: i32, %arg1: memref<8x128xf32, #tpu.memory_space<vmem>>, %arg2: memref<1x1xf32, #tpu.memory_space<vmem>>, %arg3: memref<1x128xf32, #tpu.memory_space<vmem>>) attributes {dimension_semantics = [#tpu.dimension_semantics<arbitrary>], iteration_bounds = array<i64: 1>, scalar_prefetch = 0 : i64, scratch_operands = 1 : i64, tpu.core_type = #tpu.core_type<tc>, window_params = [{transform_indices = @transform_0, window_bounds = array<i64: 8, 128>}, {pipeline_mode = #tpu.pipeline_mode<synchronous>, transform_indices = @transform_1, window_bounds = array<i64: 1, 1>}]} {
    %c0_i32 = arith.constant 0 : i32
    %0 = arith.cmpi eq, %arg0, %c0_i32 : i32
    %1 = arith.extui %0 : i1 to i32
    %c0_i32_0 = arith.constant 0 : i32
    %2 = arith.cmpi ne, %1, %c0_i32_0 : i32
    scf.if %2 {
      %cst_20 = arith.constant 0.000000e+00 : f32
      %124 = vector.broadcast %cst_20 : f32 to vector<1x128xf32>
      %c0_21 = arith.constant 0 : index
      %c0_22 = arith.constant 0 : index
      %125 = vector.load %arg3[%c0_21, %c0_22] : memref<1x128xf32, #tpu.memory_space<vmem>>, vector<1x128xf32>
      tpu.vector_store %arg3[%c0_21, %c0_22], %124 {strides = array<i32>} : memref<1x128xf32, #tpu.memory_space<vmem>>, vector<1x128xf32>,
    } else {
    }
    %c0 = arith.constant 0 : index
    %c0_1 = arith.constant 0 : index
    %3 = vector.load %arg1[%c0, %c0_1] : memref<8x128xf32, #tpu.memory_space<vmem>>, vector<8x128xf32>
    %4 = vector.extract_strided_slice %3 {offsets = [0, 0], sizes = [2, 128], strides = [1, 1]} : vector<8x128xf32> to vector<2x128xf32>
    %5 = vector.extract_strided_slice %3 {offsets = [2, 0], sizes = [2, 128], strides = [1, 1]} : vector<8x128xf32> to vector<2x128xf32>
    %6 = vector.extract_strided_slice %4 {offsets = [0, 0], sizes = [1, 128], strides = [1, 1]} : vector<2x128xf32> to vector<1x128xf32>
    %7 = vector.extract_strided_slice %4 {offsets = [1, 0], sizes = [1, 128], strides = [1, 1]} : vector<2x128xf32> to vector<1x128xf32>
    %8 = math.cos %6 : vector<1x128xf32>
    %9 = math.sin %7 : vector<1x128xf32>
    %10 = arith.mulf %8, %9 : vector<1x128xf32>
    %11 = math.sin %6 : vector<1x128xf32>
    %12 = math.cos %7 : vector<1x128xf32>
    %13 = arith.mulf %8, %12 : vector<1x128xf32>
    %14 = vector.extract_strided_slice %5 {offsets = [0, 0], sizes = [1, 128], strides = [1, 1]} : vector<2x128xf32> to vector<1x128xf32>
    %15 = vector.extract_strided_slice %5 {offsets = [1, 0], sizes = [1, 128], strides = [1, 1]} : vector<2x128xf32> to vector<1x128xf32>
    %16 = math.cos %14 : vector<1x128xf32>
    %17 = math.sin %15 : vector<1x128xf32>
    %18 = arith.mulf %16, %17 : vector<1x128xf32>
    %19 = math.sin %14 : vector<1x128xf32>
    %20 = math.cos %15 : vector<1x128xf32>
    %21 = arith.mulf %16, %20 : vector<1x128xf32>
    %22 = arith.mulf %10, %18 : vector<1x128xf32>
    %23 = arith.mulf %11, %19 : vector<1x128xf32>
    %24 = arith.addf %22, %23 : vector<1x128xf32>
    %25 = arith.mulf %13, %21 : vector<1x128xf32>
    %26 = arith.addf %24, %25 : vector<1x128xf32>
    %27 = arith.mulf %10, %10 : vector<1x128xf32>
    %28 = arith.mulf %11, %11 : vector<1x128xf32>
    %29 = arith.addf %27, %28 : vector<1x128xf32>
    %30 = arith.mulf %13, %13 : vector<1x128xf32>
    %31 = arith.addf %29, %30 : vector<1x128xf32>
    %32 = arith.mulf %18, %18 : vector<1x128xf32>
    %33 = arith.mulf %19, %19 : vector<1x128xf32>
    %34 = arith.addf %32, %33 : vector<1x128xf32>
    %35 = arith.mulf %21, %21 : vector<1x128xf32>
    %36 = arith.addf %34, %35 : vector<1x128xf32>
    %37 = arith.mulf %31, %36 : vector<1x128xf32>
    %cst = arith.constant 9.99999996E-13 : f32
    %38 = vector.broadcast %cst : f32 to vector<1x128xf32>
    %39 = arith.maximumf %37, %38 : vector<1x128xf32>
    %40 = math.rsqrt %39 : vector<1x128xf32>
    %41 = arith.mulf %26, %40 : vector<1x128xf32>
    %cst_2 = arith.constant -0.99999988 : f32
    %cst_3 = arith.constant 0.99999988 : f32
    %42 = vector.broadcast %cst_2 : f32 to vector<1x128xf32>
    %43 = arith.maximumf %42, %41 : vector<1x128xf32>
    %44 = vector.broadcast %cst_3 : f32 to vector<1x128xf32>
    %45 = arith.minimumf %44, %43 : vector<1x128xf32>
    %46 = arith.mulf %45, %45 : vector<1x128xf32>
    %cst_4 = arith.constant 1.000000e+00 : f32
    %47 = vector.broadcast %cst_4 : f32 to vector<1x128xf32>
    %48 = arith.subf %47, %46 : vector<1x128xf32>
    %cst_5 = arith.constant 0.000000e+00 : f32
    %49 = vector.broadcast %cst_5 : f32 to vector<1x128xf32>
    %50 = arith.maximumf %48, %49 : vector<1x128xf32>
    %51 = math.sqrt %50 : vector<1x128xf32>
    %52 = math.atan2 %51, %45 : vector<1x128xf32>
    %cst_6 = arith.constant 57.2957802 : f32
    %53 = vector.broadcast %cst_6 : f32 to vector<1x128xf32>
    %54 = arith.mulf %52, %53 : vector<1x128xf32>
    %55 = vector.extract_strided_slice %3 {offsets = [4, 0], sizes = [2, 128], strides = [1, 1]} : vector<8x128xf32> to vector<2x128xf32>
    %56 = vector.extract_strided_slice %3 {offsets = [6, 0], sizes = [2, 128], strides = [1, 1]} : vector<8x128xf32> to vector<2x128xf32>
    %57 = vector.extract_strided_slice %55 {offsets = [0, 0], sizes = [1, 128], strides = [1, 1]} : vector<2x128xf32> to vector<1x128xf32>
    %58 = vector.extract_strided_slice %55 {offsets = [1, 0], sizes = [1, 128], strides = [1, 1]} : vector<2x128xf32> to vector<1x128xf32>
    %59 = math.cos %57 : vector<1x128xf32>
    %60 = math.sin %58 : vector<1x128xf32>
    %61 = arith.mulf %59, %60 : vector<1x128xf32>
    %62 = math.sin %57 : vector<1x128xf32>
    %63 = math.cos %58 : vector<1x128xf32>
    %64 = arith.mulf %59, %63 : vector<1x128xf32>
    %65 = vector.extract_strided_slice %56 {offsets = [0, 0], sizes = [1, 128], strides = [1, 1]} : vector<2x128xf32> to vector<1x128xf32>
    %66 = vector.extract_strided_slice %56 {offsets = [1, 0], sizes = [1, 128], strides = [1, 1]} : vector<2x128xf32> to vector<1x128xf32>
    %67 = math.cos %65 : vector<1x128xf32>
    %68 = math.sin %66 : vector<1x128xf32>
    %69 = arith.mulf %67, %68 : vector<1x128xf32>
    %70 = math.sin %65 : vector<1x128xf32>
    %71 = math.cos %66 : vector<1x128xf32>
    %72 = arith.mulf %67, %71 : vector<1x128xf32>
    %73 = arith.mulf %61, %69 : vector<1x128xf32>
    %74 = arith.mulf %62, %70 : vector<1x128xf32>
    %75 = arith.addf %73, %74 : vector<1x128xf32>
    %76 = arith.mulf %64, %72 : vector<1x128xf32>
    %77 = arith.addf %75, %76 : vector<1x128xf32>
    %78 = arith.mulf %61, %61 : vector<1x128xf32>
    %79 = arith.mulf %62, %62 : vector<1x128xf32>
    %80 = arith.addf %78, %79 : vector<1x128xf32>
    %81 = arith.mulf %64, %64 : vector<1x128xf32>
    %82 = arith.addf %80, %81 : vector<1x128xf32>
    %83 = arith.mulf %69, %69 : vector<1x128xf32>
    %84 = arith.mulf %70, %70 : vector<1x128xf32>
    %85 = arith.addf %83, %84 : vector<1x128xf32>
    %86 = arith.mulf %72, %72 : vector<1x128xf32>
    %87 = arith.addf %85, %86 : vector<1x128xf32>
    %88 = arith.mulf %82, %87 : vector<1x128xf32>
    %cst_7 = arith.constant 9.99999996E-13 : f32
    %89 = vector.broadcast %cst_7 : f32 to vector<1x128xf32>
    %90 = arith.maximumf %88, %89 : vector<1x128xf32>
    %91 = math.rsqrt %90 : vector<1x128xf32>
    %92 = arith.mulf %77, %91 : vector<1x128xf32>
    %cst_8 = arith.constant -0.99999988 : f32
    %cst_9 = arith.constant 0.99999988 : f32
    %93 = vector.broadcast %cst_8 : f32 to vector<1x128xf32>
    %94 = arith.maximumf %93, %92 : vector<1x128xf32>
    %95 = vector.broadcast %cst_9 : f32 to vector<1x128xf32>
    %96 = arith.minimumf %95, %94 : vector<1x128xf32>
    %97 = arith.mulf %96, %96 : vector<1x128xf32>
    %cst_10 = arith.constant 1.000000e+00 : f32
    %98 = vector.broadcast %cst_10 : f32 to vector<1x128xf32>
    %99 = arith.subf %98, %97 : vector<1x128xf32>
    %cst_11 = arith.constant 0.000000e+00 : f32
    %100 = vector.broadcast %cst_11 : f32 to vector<1x128xf32>
    %101 = arith.maximumf %99, %100 : vector<1x128xf32>
    %102 = math.sqrt %101 : vector<1x128xf32>
    %103 = math.atan2 %102, %96 : vector<1x128xf32>
    %cst_12 = arith.constant 57.2957802 : f32
    %104 = vector.broadcast %cst_12 : f32 to vector<1x128xf32>
    %105 = arith.mulf %103, %104 : vector<1x128xf32>
    %106 = tpu.iota {dimensions = array<i32: 1>} : vector<1x128xi32>
    %c128_i32 = arith.constant 128 : i32
    %107 = arith.muli %arg0, %c128_i32 : i32
    %108 = vector.broadcast %107 : i32 to vector<1x128xi32>
    %109 = arith.addi %106, %108 : vector<1x128xi32>
    %c8_i32 = arith.constant 8 : i32
    %110 = vector.broadcast %c8_i32 : i32 to vector<1x128xi32>
    %111 = arith.cmpi slt, %109, %110 : vector<1x128xi32>
    %112 = arith.extui %111 : vector<1x128xi1> to vector<1x128xi32>
    %113 = arith.sitofp %112 : vector<1x128xi32> to vector<1x128xf32>
    %c0_13 = arith.constant 0 : index
    %c0_14 = arith.constant 0 : index
    %114 = vector.load %arg3[%c0_13, %c0_14] : memref<1x128xf32, #tpu.memory_space<vmem>>, vector<1x128xf32>
    %cst_15 = arith.constant 1.000000e+00 : f32
    %115 = vector.broadcast %cst_15 : f32 to vector<1x128xf32>
    %116 = arith.mulf %115, %105 : vector<1x128xf32>
    %117 = arith.addf %54, %116 : vector<1x128xf32>
    %118 = arith.mulf %117, %113 : vector<1x128xf32>
    %119 = arith.addf %114, %118 : vector<1x128xf32>
    %c0_16 = arith.constant 0 : index
    %c0_17 = arith.constant 0 : index
    %120 = vector.load %arg3[%c0_16, %c0_17] : memref<1x128xf32, #tpu.memory_space<vmem>>, vector<1x128xf32>
    tpu.vector_store %arg3[%c0_16, %c0_17], %119 {strides = array<i32>} : memref<1x128xf32, #tpu.memory_space<vmem>>, vector<1x128xf32>,
    %c0_i32_18 = arith.constant 0 : i32
    %121 = arith.cmpi eq, %arg0, %c0_i32_18 : i32
    %122 = arith.extui %121 : i1 to i32
    %c0_i32_19 = arith.constant 0 : i32
    %123 = arith.cmpi ne, %122, %c0_i32_19 : i32
    scf.if %123 {
      %c0_20 = arith.constant 0 : index
      %c0_21 = arith.constant 0 : index
      %124 = vector.load %arg3[%c0_20, %c0_21] : memref<1x128xf32, #tpu.memory_space<vmem>>, vector<1x128xf32>
      %cst_22 = arith.constant dense<0.000000e+00> : vector<1xf32>
      %125 = vector.multi_reduction <add>, %124, %cst_22 [1] : vector<1x128xf32> to vector<1xf32>
      %126 = vector.shape_cast %125 : vector<1xf32> to vector<1x1xf32>
      %cst_23 = arith.constant 1.250000e-01 : f32
      %127 = vector.broadcast %cst_23 : f32 to vector<1x1xf32>
      %128 = arith.mulf %126, %127 : vector<1x1xf32>
      %c0_24 = arith.constant 0 : index
      %c0_25 = arith.constant 0 : index
      %129 = vector.load %arg2[%c0_24, %c0_25] : memref<1x1xf32, #tpu.memory_space<vmem>>, vector<1x1xf32>
      tpu.vector_store %arg2[%c0_24, %c0_25], %128 {strides = array<i32>} : memref<1x1xf32, #tpu.memory_space<vmem>>, vector<1x1xf32>,
    } else {
    }
    return
  }
  func.func @transform_0(%arg0: i32) -> (i32, i32) {
    %c0_i32 = arith.constant 0 : i32
    %c0_i32_0 = arith.constant 0 : i32
    return %c0_i32, %arg0 : i32, i32
  }
  func.func @transform_1(%arg0: i32) -> (i32, i32) {
    %c0_i32 = arith.constant 0 : i32
    %c0_i32_0 = arith.constant 0 : i32
    %c0_i32_1 = arith.constant 0 : i32
    return %c0_i32, %c0_i32_0 : i32, i32
  }
}

</mosaic_0001>

<bundles_post_ra>
// kernel: tpu_custom_call.1
= control target key start
LH: loop header
LB: loop body
LE: loop exit
PB: predicated region body
PF: predicated region fallthrough
CT: control target
= control target key end

     0   :  { %6 = vsyncpa [#allocation4], 0  ;;  %s683_s0 = inlined_call_operand.hbm [shape: f32[8,128], index: 0, kind: input, shape index: {}]   ;;  %s684_s1 = inlined_call_operand.hbm [shape: f32[1,1], index: 1, kind: output, shape index: {}]  }
   0x1   :  { %7 = vsyncpa [#allocation5], 0  ;;  %s13_s8 = sshll.u32 %s683_s0, 4  ;;  %s579_s9 = smov [#allocation3]   ;;  %s14_s8 = int_to_ptr.hbm [resolvable:$true] %s13_s8 }
   0x2   :  { %s15_s10 = sshll.u32 %s579_s9, 4  ;;  %s16_s10 = int_to_ptr.vmem [resolvable:$true] %s15_s10 }
   0x3   :  { %18 = dma.hbm_to_vmem [thread:$0]  %s14_s8, 128, %s16_s10, [#allocation4]  }
   0x4   :  { %575 = dma.done.wait [#allocation4], 128  }
   0x5   :  { %576 = vsyncadd [#allocation4], 4294967168  ;;  %v580_v0 = vmov 0.0   ;;  %v604_v1 = vld [vmem:[#allocation3] sm:$0xff]  ;;  %v581_v13 = vmov 683565275  }
   0x6   :  { %27 = vst [vmem:[#allocation2] sm:$0x1] %v580_v0  ;;  %v32_v2 = vand.u32 2139095040, %v604_v1  ;;  %v29_v4 = vand.u32 2147483647, %v604_v1  ;;  %vm31_vm12 = vcmp.lt.s32.totalorder %v604_v1, 0 }
   0x7   :  { %v582_v15 = vmov 2475754826   ;;  %v583_v17 = vmov 2131351028   ;;  %v584_v19 = vmov 2102212464  }
   0x8   :  { %v33_v3 = vshrl.u32 %v32_v2, 23  ;;  %v36_v7 = vand.u32 8388607, %v29_v4  ;;  %v585_v21 = vmov 920167782   ;;  %s589_s0 = smov [#allocation6]  }
   0x9   :  { %v586_v27 = vmov 1326507024   ;;  %vm30_vm13 = vcmp.le.f32.partialorder %v29_v4, 0.7853982  ;;  %s490_s11 = sshll.u32 %s589_s0, 4  ;;  %s492_s14 = sshll.u32 %s684_s1, 4  ;;  %s491_s11 = int_to_ptr.vmem [resolvable:$true] %s490_s11  ;;  %s493_s14 = int_to_ptr.hbm [resolvable:$true] %s492_s14 }
   0xa   :  { %v502_v5 = vadd.s32 4294967169, %v33_v3  ;;  %v37_v10 = vor.u32 8388608, %v36_v7  ;;  %v587_v3 = vmov 0  }
   0xc   :  { %v39_v6 = vadd.s32 1, %v502_v5  ;;  %v613_v29 = vshll.u32 %v37_v10, 8 }
   0xe   :  { %vm40_vm0 = vcmp.gt.s32.totalorder %v39_v6, 0  ;;  %v78_v41 = vand.u32 65535, %v613_v29  ;;  %v79_v42 = vshrl.u32 %v613_v29, 16 }
   0xf   :  { %v41_v8 = vsel %vm40_vm0, %v39_v6, 0 }
  0x10   :  { %v43_v9 = vand.u32 31, %v41_v8  ;;  %v610_v11 = vshrl.u32 %v41_v8, 5 }
  0x12   :  { %v44_v12 = vsub.s32 32, %v43_v9  ;;  %v46_v14 = vshll.u32 %v581_v13, %v43_v9  ;;  %v49_v16 = vshll.u32 %v582_v15, %v43_v9  ;;  %v52_v18 = vshll.u32 %v583_v17, %v43_v9 }
  0x13   :  { %v55_v20 = vshll.u32 %v584_v19, %v43_v9  ;;  %v58_v22 = vshll.u32 %v585_v21, %v43_v9  ;;  %vm61_vm1 = vcmp.lt.s32.totalorder %v610_v11, 1  ;;  %vm64_vm2 = vcmp.lt.s32.totalorder %v610_v11, 4 }
  0x14   :  { %v47_v23 = vshrl.u32 %v582_v15, %v44_v12  ;;  %v50_v24 = vshrl.u32 %v583_v17, %v44_v12  ;;  %v53_v25 = vshrl.u32 %v584_v19, %v44_v12  ;;  %v56_v26 = vshrl.u32 %v585_v21, %v44_v12 }
  0x15   :  { %v59_v28 = vshrl.u32 %v586_v27, %v44_v12  ;;  %vm63_vm3 = vcmp.lt.s32.totalorder %v610_v11, 3  ;;  %vm62_vm4 = vcmp.lt.s32.totalorder %v610_v11, 2  ;;  %v45_v49 = vshrl.u32 %v581_v13, %v44_v12 }
  0x16   :  { %v48_v30 = vor.u32 %v47_v23, %v46_v14  ;;  %v51_v31 = vor.u32 %v50_v24, %v49_v16  ;;  %v54_v32 = vor.u32 %v53_v25, %v52_v18  ;;  %v57_v33 = vor.u32 %v56_v26, %v55_v20 }
  0x17   :  { %v60_v34 = vor.u32 %v59_v28, %v58_v22 }
  0x18   :  { %v69_v35 = vsel %vm61_vm1, %v48_v30, %v51_v31  ;;  %v73_v36 = vsel %vm61_vm1, %v51_v31, %v54_v32  ;;  %v70_v37 = vsel %vm64_vm2, %v57_v33, 920167782  ;;  %v65_v62 = vsel %vm61_vm1, %v45_v49, %v48_v30 }
  0x19   :  { %v74_v38 = vsel %vm64_vm2, %v60_v34, 1326507024  ;;  %v71_v39 = vsel %vm63_vm3, %v54_v32, %v70_v37  ;;  %v66_v2 = vsel %vm64_vm2, %v54_v32, 2102212464 }
  0x1a   :  { %v75_v40 = vsel %vm63_vm3, %v57_v33, %v74_v38  ;;  %v72_v43 = vsel %vm62_vm4, %v69_v35, %v71_v39  ;;  %v67_v14 = vsel %vm63_vm3, %v51_v31, %v66_v2 }
  0x1b   :  { %v76_v44 = vsel %vm62_vm4, %v73_v36, %v75_v40  ;;  %v102_v47 = vand.u32 65535, %v72_v43  ;;  %v103_v48 = vshrl.u32 %v72_v43, 16  ;;  %v68_v22 = vsel %vm62_vm4, %v65_v62, %v67_v14 }
  0x1c   :  { %v80_v45 = vand.u32 65535, %v76_v44  ;;  %v81_v46 = vshrl.u32 %v76_v44, 16  ;;  %v122_v26 = vmul.u32 %v613_v29, %v68_v22  ;;  %vm172_vm4 = vweird.f32 %v604_v1 }
  0x1d   :  { %v104_v53 = vmul.u32 %v102_v47, %v78_v41  ;;  %v105_v54 = vmul.u32 %v103_v48, %v78_v41  ;;  %v106_v55 = vmul.u32 %v102_v47, %v79_v42  ;;  %v107_v59 = vmul.u32 %v103_v48, %v79_v42 }
  0x1e   :  { %v82_v50 = vmul.u32 %v80_v45, %v78_v41  ;;  %v83_v51 = vmul.u32 %v81_v46, %v78_v41  ;;  %v84_v52 = vmul.u32 %v80_v45, %v79_v42  ;;  %v85_v56 = vmul.u32 %v81_v46, %v79_v42 }
  0x1f   :  { %v108_v60 = vshll.u32 %v105_v54, 16  ;;  %v110_v61 = vshll.u32 %v106_v55, 16  ;;  %v109_v12 = vshrl.u32 %v105_v54, 16  ;;  %v111_v18 = vshrl.u32 %v106_v55, 16 }
  0x20   :  { %v86_v57 = vshll.u32 %v83_v51, 16  ;;  %v88_v58 = vshll.u32 %v84_v52, 16  ;;  %v87_v7 = vshrl.u32 %v83_v51, 16  ;;  %v89_v15 = vshrl.u32 %v84_v52, 16 }
  0x21   :  { %vm112_vm6 = vc.u32 %v104_v53, %v108_v60  ;;  %v114_v6 = vadd.s32 %v108_v60, %v104_v53 }
  0x22   :  { %vm90_vm5 = vc.u32 %v82_v50, %v86_v57  ;;  %v92_v63 = vadd.s32 %v86_v57, %v82_v50  ;;  %v113_v9 = vsel %vm112_vm6, 1, %v587_v3 }
  0x23   :  { %v91_v5 = vsel %vm90_vm5, 1, %v587_v3  ;;  %v115_v13 = vadd.s32 %v113_v9, %v107_v59  ;;  %vm116_vm8 = vc.u32 %v114_v6, %v110_v61  ;;  %v118_v21 = vadd.s32 %v114_v6, %v110_v61 }
  0x24   :  { %v93_v8 = vadd.s32 %v91_v5, %v85_v56  ;;  %vm94_vm7 = vc.u32 %v92_v63, %v88_v58  ;;  %v117_v17 = vsel %vm116_vm8, 1, %v587_v3 }
  0x25   :  { %v95_v10 = vsel %vm94_vm7, 1, %v587_v3  ;;  %v119_v19 = vadd.s32 %v117_v17, %v115_v13 }
  0x26   :  { %v97_v16 = vadd.s32 %v95_v10, %v93_v8 }
  0x27   :  { %v120_v23 = vadd.s32 %v119_v19, %v109_v12 }
  0x28   :  { %v98_v20 = vadd.s32 %v97_v16, %v87_v7 }
  0x29   :  { %v121_v25 = vadd.s32 %v120_v23, %v111_v18 }
  0x2a   :  { %v99_v24 = vadd.s32 %v98_v20, %v89_v15 }
  0x2b   :  { %v125_v27 = vadd.s32 1, %v121_v25 }
  0x2c   :  { %vm124_vm9 = vc.u32 %v99_v24, %v118_v21  ;;  %v123_v11 = vadd.s32 %v118_v21, %v99_v24 }
  0x2d   :  { %v126_v28 = vsel %vm124_vm9, %v125_v27, %v121_v25 }
  0x2e   :  { %v127_v30 = vadd.s32 %v126_v28, %v122_v26 }
  0x30   :  { %v128_v31 = vadd.s32 536870912, %v127_v30 }
  0x32   :  { %v129_v32 = vshrl.u32 %v128_v31, 30 }
  0x34   :  { %v130_v33 = vshll.u32 %v129_v32, 30  ;;  %v153_v50 = vsub.s32 4, %v129_v32 }
  0x36   :  { %v131_v34 = vsub.s32 %v127_v30, %v130_v33  ;;  %v154_v53 = vsel %vm31_vm12, %v153_v50, %v129_v32 }
  0x37   :  { %v156_v56 = vsel %vm30_vm13, 0, %v154_v53 }
  0x38   :  { %vm132_vm10 = vcmp.lt.s32.totalorder %v131_v34, 0  ;;  %v133_v35 = vsub.s32 0, %v131_v34  ;;  %v327_v61 = vadd.s32 3, %v156_v56  ;;  %v173_v5 = vand.u32 3, %v156_v56 }
  0x3a   :  { %v134_v36 = vsel %vm132_vm10, %v133_v35, %v131_v34  ;;  %v328_v6 = vand.u32 3, %v327_v61  ;;  %vm178_vm14 = vcmp.eq.s32.totalorder %v173_v5, 2  ;;  %vm174_vm0 = vcmp.lt.s32.totalorder %v173_v5, 2 }
  0x3b   :  { %v135_v37 = vclz %v134_v36  ;;  %vm175_vm1 = vcmp.eq.s32.totalorder %v173_v5, 0 }
  0x3c   :  { %vm333_vm15 = vcmp.eq.s32.totalorder %v328_v6, 2  ;;  %vm330_vm2 = vcmp.eq.s32.totalorder %v328_v6, 0  ;;  %vm329_vm3 = vcmp.lt.s32.totalorder %v328_v6, 2 }
  0x3d   :  { %v503_v38 = vadd.s32 4294967294, %v135_v37 }
  0x3f   :  { %vm504_vm11 = vcmp.lt.s32.totalorder %v503_v38, 0 }
  0x40   :  { %v138_v39 = vsel %vm504_vm11, 0, %v503_v38 }
  0x41   :  { %v139_v40 = vsub.s32 32, %v138_v39  ;;  %v140_v41 = vshll.u32 %v131_v34, %v138_v39  ;;  %v143_v42 = vsub.s32 4294967266, %v138_v39 }
  0x43   :  { %v141_v29 = vshrl.u32 %v123_v11, %v139_v40  ;;  %v144_v43 = vadd.s32 127, %v143_v42 }
  0x45   :  { %v142_v44 = vor.u32 %v141_v29, %v140_v41  ;;  %v145_v45 = vshll.u32 %v144_v43, 23 }
  0x47   :  { %v146_v46 = vor.u32 4788187, %v145_v45  ;;  %v149_v47 = vcvt.s32.f32 %v142_v44 }
  0x49   :  { %v147_v48 = vand.u32 2147483647, %v146_v46 }
  0x4b   :  { %v150_v49 = vmul.f32 %v149_v47, %v147_v48 }
  0x4d   :  { %v151_v51 = vxor.u32 2147483648, %v150_v49 }
  0x4f   :  { %v152_v52 = vsel %vm31_vm12, %v151_v51, %v150_v49 }
  0x50   :  { %v155_v54 = vsel %vm30_vm13, %v604_v1, %v152_v52 }
  0x51   :  { %v157_v55 = vmul.f32 %v155_v54, %v155_v54 }
  0x53   :  { %v158_v57 = vmul.f32 -0.001358992, %v157_v55  ;;  %v165_v58 = vmul.f32 -0.00019511016, %v157_v55 }
  0x55   :  { %v159_v59 = vadd.f32 0.041655596, %v158_v57  ;;  %v166_v60 = vadd.f32 0.008332121, %v165_v58 }
  0x57   :  { %v160_v62 = vmul.f32 %v159_v59, %v157_v55  ;;  %v167_v63 = vmul.f32 %v166_v60, %v157_v55 }
  0x59   :  { %v161_v2 = vadd.f32 -0.4999988, %v160_v62  ;;  %v168_v3 = vadd.f32 -0.16666654, %v167_v63 }
  0x5b   :  { %v162_v7 = vmul.f32 %v161_v2, %v157_v55  ;;  %v169_v4 = vmul.f32 %v168_v3, %v157_v55 }
  0x5d   :  { %v163_v8 = vadd.f32 1.0, %v162_v7  ;;  %v170_v9 = vadd.f32 1.0, %v169_v4 }
  0x5f   :  { %v171_v10 = vmul.f32 %v170_v9, %v155_v54  ;;  %v179_v12 = vxor.u32 2147483648, %v163_v8 }
  0x61   :  { %v176_v13 = vxor.u32 2147483648, %v171_v10  ;;  %v180_v14 = vsel %vm178_vm14, %v179_v12, %v171_v10  ;;  %v335_v15 = vsel %vm333_vm15, %v179_v12, %v171_v10 }
  0x63   :  { %v177_v16 = vsel %vm175_vm1, %v163_v8, %v176_v13  ;;  %v332_v17 = vsel %vm330_vm2, %v163_v8, %v176_v13 }
  0x64   :  { %v181_v18 = vsel %vm174_vm0, %v177_v16, %v180_v14  ;;  %v336_v19 = vsel %vm329_vm3, %v332_v17, %v335_v15 }
  0x65   :  { %v182_v20 = vsel %vm172_vm4, nan, %v181_v18  ;;  %v337_v21 = vsel %vm172_vm4, nan, %v336_v19 }
  0x66   :  { %v339_v22 = vrot.slane %v337_v21, 1  ;;  %v343_v23 = vrot.slane %v182_v20, 1  ;;  %v360_v26 = vmul.f32 %v337_v21, %v337_v21  ;;  %v350_v35 = vrot.slane %v337_v21, 2 }
  0x68   :  { %v341_v24 = vmul.f32 %v339_v22, %v182_v20  ;;  %v345_v25 = vmul.f32 %v343_v23, %v182_v20  ;;  %v352_v38 = vmul.f32 %v350_v35, %v337_v21 }
  0x6a   :  { %v359_v27 = vmul.f32 %v341_v24, %v341_v24  ;;  %v362_v28 = vmul.f32 %v345_v25, %v345_v25  ;;  %v347_v1 = vrot.slane %v341_v24, 2  ;;  %v355_v11 = vrot.slane %v345_v25, 2 }
  0x6c   :  { %v361_v30 = vadd.f32 %v360_v26, %v359_v27  ;;  %v349_v37 = vmul.f32 %v347_v1, %v341_v24  ;;  %v357_v42 = vmul.f32 %v355_v11, %v345_v25 }
  0x6e   :  { %v363_v31 = vadd.f32 %v362_v28, %v361_v30  ;;  %v353_v41 = vadd.f32 %v352_v38, %v349_v37 }
  0x70   :  { %v365_v32 = vrot.slane %v363_v31, 2  ;;  %v358_v44 = vadd.f32 %v357_v42, %v353_v41  ;;  %v458_v42 = vlaneseq }
  0x72   :  { %v367_v33 = vmul.f32 %v365_v32, %v363_v31 }
  0x74   :  { %v368_v34 = vmax.f32 %v367_v33, 1e-12 }
  0x76   :  { %521 = vrsqrt.f32 %v368_v34  ;;  %vm375_vm5 = vweird.f32 %v368_v34 }
  0x7c   :  { %v522_v36 = vpop.eup %521 }
  0x7d   :  { %v370_v39 = vmul.f32 %v522_v36, %v368_v34  ;;  %vm376_vm6 = vweird.f32 %v522_v36 }
  0x7e   :  { %vm377_vm7 = vmor %vm375_vm5, %vm376_vm6 }
  0x7f   :  { %v371_v40 = vmul.f32 %v522_v36, %v370_v39 }
  0x81   :  { %v372_v29 = vmul.f32 0.5, %v371_v40  ;;  %v588_v40 = vmov 0.7853982  }
  0x83   :  { %v373_v43 = vsub.f32 1.5, %v372_v29 }
  0x85   :  { %v374_v45 = vmul.f32 %v522_v36, %v373_v43 }
  0x87   :  { %v378_v46 = vsel %vm377_vm7, %v522_v36, %v374_v45 }
  0x88   :  { %v379_v47 = vmul.f32 %v378_v46, %v358_v44 }
  0x8a   :  { %v650_v48 = vclamps-f32 %v379_v47, 0.9999999  ;;  %v459_v47 = vand.u32 127, %v458_v42 }
  0x8c   :  { %v382_v49 = vmul.f32 %v650_v48, %v650_v48  ;;  %v397_v61 = vand.u32 2147483647, %v650_v48  ;;  %vm444_vm14 = vcmp.ne.f32.partialorder %v650_v48, %v650_v48  ;;  %vm440_vm5 = vcmp.lt.s32.totalorder %v650_v48, 0 }
  0x8d   :  { %vm437_vm6 = vcmp.lt.f32.partialorder %v650_v48, 0.0  ;;  %v441_v11 = vsel %vm440_vm5, 3.1415927, %v580_v0 }
  0x8e   :  { %v383_v50 = vsub.f32 1.0, %v382_v49  ;;  %vm450_vm1 = vcmp.eq.s32.totalorder %v397_v61, inf  ;;  %v449_v41 = vsel %vm437_vm6, 2.3561945, %v588_v40 }
  0x90   :  { %v384_v51 = vmax.f32 %v383_v50, 0.0 }
  0x92   :  { %523 = vrsqrt.f32 %v384_v51  ;;  %vm392_vm8 = vcmp.eq.f32.partialorder %v384_v51, inf  ;;  %v395_v58 = vand.u32 2147483648, %v384_v51  ;;  %vm394_vm9 = vcmp.eq.f32.partialorder %v384_v51, 0.0 }
  0x98   :  { %v524_v52 = vpop.eup %523 }
  0x99   :  { %v386_v53 = vmul.f32 %v524_v52, %v384_v51 }
  0x9b   :  { %v387_v54 = vmul.f32 %v524_v52, %v386_v53  ;;  %v466_v53 = vld [vmem:[#allocation2] sm:$0x1] }
  0x9d   :  { %v388_v55 = vmul.f32 0.5, %v387_v54 }
  0x9f   :  { %v389_v56 = vsub.f32 1.5, %v388_v55 }
  0xa1   :  { %v390_v57 = vmul.f32 %v524_v52, %v389_v56 }
  0xa3   :  { %v391_v59 = vmul.f32 %v390_v57, %v384_v51 }
  0xa5   :  { %v393_v60 = vsel %vm392_vm8, %v384_v51, %v391_v59  ;;  %vm463_vm8 = vcmp.lt.s32.totalorder %v459_v47, 8 }
  0xa6   :  { %v655_v62 = vsel %vm394_vm9, %v395_v58, %v393_v60  ;;  %v509_v51 = vsel %vm463_vm8, 1.0, %v580_v0  ;;  %vm478_vm9 = vcmask 1040384  }
  0xa7   :  { %v398_v63 = vand.u32 2147483647, %v655_v62  ;;  %vm445_vm15 = vcmp.ne.f32.partialorder %v655_v62, %v655_v62  ;;  %vm442_vm7 = vcmp.eq.f32.partialorder %v655_v62, 0.0  ;;  %v455_v44 = vand.u32 2147483648, %v655_v62 }
  0xa8   :  { %vm662_vm0 = vmor %vm444_vm14, %vm445_vm15 }
  0xa9   :  { %v400_v2 = vmax.f32 %v397_v61, %v398_v63  ;;  %v399_v10 = vmin.f32 %v397_v61, %v398_v63  ;;  %vm451_vm2 = vcmp.eq.s32.totalorder %v398_v63, inf  ;;  %vm434_vm4 = vcmp.gt.f32.partialorder %v398_v63, %v397_v61 }
  0xaa   :  { %vm666_vm3 = vmand %vm450_vm1, %vm451_vm2 }
  0xab   :  { %525 = vrcp.f32 %v400_v2  ;;  %v412_v6 = vand.u32 2147483648, %v400_v2  ;;  %vm406_vm10 = vweird.f32 %v400_v2  ;;  %v410_v4 = vand.u32 2147483647, %v400_v2 }
  0xad   :  { %v413_v9 = vor.u32 1.1754944e-38, %v412_v6  ;;  %vm411_vm13 = vcmp.eq.f32.partialorder %v410_v4, 8.507059e+37 }
  0xb1   :  { %v526_v3 = vpop.eup %525 }
  0xb2   :  { %v402_v5 = vmul.f32 %v526_v3, %v400_v2  ;;  %vm407_vm11 = vweird.f32 %v526_v3 }
  0xb3   :  { %vm408_vm12 = vmor %vm406_vm10, %vm407_vm11  ;;  %vm483_vm10 = vcmask 0  }
  0xb4   :  { %v403_v7 = vsub.f32 1.0, %v402_v5 }
  0xb6   :  { %v404_v8 = vmul.f32 %v526_v3, %v403_v7 }
  0xb8   :  { %v405_v12 = vadd.f32 %v526_v3, %v404_v8 }
  0xba   :  { %v409_v13 = vsel %vm408_vm12, %v526_v3, %v405_v12 }
  0xbb   :  { %v414_v14 = vsel %vm411_vm13, %v413_v9, %v409_v13 }
  0xbc   :  { %v415_v15 = vmul.f32 %v414_v14, %v399_v10 }
  0xbe   :  { %v416_v16 = vmul.f32 %v415_v15, %v415_v15 }
  0xc0   :  { %v417_v17 = vmul.f32 0.002785687, %v416_v16 }
  0xc2   :  { %v418_v18 = vadd.f32 -0.015866, %v417_v17 }
  0xc4   :  { %v419_v19 = vmul.f32 %v418_v18, %v416_v16 }
  0xc6   :  { %v420_v20 = vadd.f32 0.04247222, %v419_v19 }
  0xc8   :  { %v421_v21 = vmul.f32 %v420_v20, %v416_v16 }
  0xca   :  { %v422_v24 = vadd.f32 -0.074975304, %v421_v21 }
  0xcc   :  { %v423_v25 = vmul.f32 %v422_v24, %v416_v16 }
  0xce   :  { %v424_v26 = vadd.f32 0.1064488, %v423_v25 }
  0xd0   :  { %v425_v27 = vmul.f32 %v424_v26, %v416_v16 }
  0xd2   :  { %v426_v28 = vadd.f32 -0.14207031, %v425_v27 }
  0xd4   :  { %v427_v30 = vmul.f32 %v426_v28, %v416_v16 }
  0xd6   :  { %v428_v31 = vadd.f32 0.19993454, %v427_v30 }
  0xd8   :  { %v429_v32 = vmul.f32 %v428_v31, %v416_v16 }
  0xda   :  { %v430_v33 = vadd.f32 -0.33333147, %v429_v32 }
  0xdc   :  { %v431_v34 = vmul.f32 %v430_v33, %v416_v16 }
  0xde   :  { %v432_v1 = vmul.f32 %v431_v34, %v415_v15 }
  0xe0   :  { %v433_v35 = vadd.f32 %v432_v1, %v415_v15 }
  0xe2   :  { %v435_v36 = vsub.f32 1.5707964, %v433_v35 }
  0xe4   :  { %v436_v37 = vsel %vm434_vm4, %v435_v36, %v433_v35 }
  0xe5   :  { %v438_v38 = vsub.f32 3.1415927, %v436_v37 }
  0xe7   :  { %v439_v39 = vsel %vm437_vm6, %v438_v38, %v436_v37 }
  0xe8   :  { %v443_v29 = vsel %vm442_vm7, %v441_v11, %v439_v39 }
  0xe9   :  { %v447_v43 = vsel %vm662_vm0, nan, %v443_v29 }
  0xea   :  { %v453_v45 = vsel %vm666_vm3, %v449_v41, %v447_v43 }
  0xeb   :  { %v454_v46 = vand.u32 2147483647, %v453_v45 }
  0xed   :  { %v456_v48 = vor.u32 %v455_v44, %v454_v46 }
  0xef   :  { %v457_v49 = vmul.f32 57.29578, %v456_v48 }
  0xf1   :  { %v468_v50 = vrot.slane %v457_v49, 4 }
  0xf3   :  { %v470_v52 = vadd.f32 %v468_v50, %v457_v49 }
  0xf5   :  { %v471_v54 = vmul.f32 %v509_v51, %v470_v52 }
  0xf7   :  { %v472_v55 = vadd.f32 %v471_v54, %v466_v53 }
  0xf9   :  { %473 = vst [vmem:[#allocation2] sm:$0x1] %v472_v55 }
 0x100   :  { %v477_v56 = vld [vmem:[#allocation2] sm:$0x1] }
 0x101   :  { %v479_v57 = vsel %vm478_vm9, %v477_v56, 0.0 }
 0x102   :  { %480 = vadd.xlane.f32.xlu0 %v479_v57 }
 0x175   :  { %v481_v58 = vpop.xlane.xlu0 %480 }
 0x176   :  { %v482_v59 = vmul.f32 0.125, %v481_v58 }
 0x178   :  { %484 = vst.msk [vmem:[#allocation6] sm:$0x1] %vm483_vm10, %v482_v59 }
 0x179   :  { %495 = dma.vmem_to_hbm [thread:$0]  %s491_s11, 16, %s493_s14, [#allocation5]  }
 0x17a   :  { %577 = dma.done.wait [#allocation5], 16  }
 0x17b   :  { %578 = vsyncadd [#allocation5], 4294967280 }
 0x17c   :  { %500 = vsyncpa [#allocation4], 1 }
 0x17d   :  { %501 = vsyncpa [#allocation5], 1 }

</bundles_post_ra>
